<compile_context>
chip_gen: v6e
topology: v6e:2x2x1
jax: 0.10.0
libtpu: 0.0.40
codegen_flags: <defaults>
</compile_context>

<pallas_src>
import functools

import jax
import jax.numpy as jnp
from jax.experimental import pallas as pl
from jax.experimental.pallas import tpu as pltpu


def _layernorm_kernel(x_ref, gamma_ref, beta_ref, o_ref, *, epsilon, d):
    x = x_ref[...].astype(jnp.float32)                       # (TM, D)
    gamma = gamma_ref[...].astype(jnp.float32)                # (1, D)
    beta = beta_ref[...].astype(jnp.float32)                  # (1, D)

    # Two lane (XLU) reductions total: mean and sum of squared diffs.
    mean = jnp.mean(x, axis=-1, keepdims=True)                # (TM, 1)
    diff = x - mean                                           # (TM, D), reused for output
    # unbiased variance (ddof=1) to match torch.Tensor.std default
    var = jnp.sum(diff * diff, axis=-1, keepdims=True) * (1.0 / (d - 1))
    std = jnp.sqrt(var)                                       # (TM, 1)

    # Per-row reciprocal (only TM of them) instead of a (TM, D) divide.
    inv = pl.reciprocal(std + epsilon, approx=False)          # (TM, 1), exact
    o_ref[...] = (diff * (gamma * inv) + beta).astype(o_ref.dtype)


def layer_norm(x, gamma, beta, epsilon=1e-6, *, block_rows=None):
    """x: [B, L, D], gamma/beta: [D]. Returns [B, L, D]."""
    B, L, D = x.shape
    rows = B * L

    x2 = x.reshape(rows, D)
    gamma2 = gamma.reshape(1, D)
    beta2 = beta.reshape(1, D)

    # Pick the largest row tile that keeps a single f32 (block_rows, D) buffer
    # around ~6 MiB (double-buffered in + out => ~24 MiB, fits every chip's
    # VMEM including v7x's 64 MiB physical). Cap at 1024 rows, multiple of 8.
    if block_rows is None:
        budget_bytes = 6 * 1024 * 1024
        br = budget_bytes // (D * 4)
        br = max(8, min(1024, (br // 8) * 8))
        # Don't make the tile bigger than the (8-row padded) problem itself.
        rows_up8 = ((rows + 7) // 8) * 8
        block_rows = int(min(br, rows_up8))

    # Pad the row count up to a multiple of block_rows (padded rows are zeros:
    # diff=0 there, so no NaNs; they are sliced off afterwards).
    grid_rows = pl.cdiv(rows, block_rows)
    padded_rows = grid_rows * block_rows
    if padded_rows != rows:
        x2 = jnp.pad(x2, ((0, padded_rows - rows), (0, 0)))

    kernel = functools.partial(_layernorm_kernel, epsilon=epsilon, d=D)

    out = pl.pallas_call(
        kernel,
        out_shape=jax.ShapeDtypeStruct((padded_rows, D), x.dtype),
        grid_spec=pltpu.PrefetchScalarGridSpec(
            num_scalar_prefetch=0,
            grid=(grid_rows,),
            in_specs=[
                pl.BlockSpec((block_rows, D), lambda i: (i, 0)),
                # gamma/beta: whole array resident in VMEM for the entire call.
                pl.BlockSpec(memory_space=pltpu.MemorySpace.VMEM),
                pl.BlockSpec(memory_space=pltpu.MemorySpace.VMEM),
            ],
            out_specs=pl.BlockSpec((block_rows, D), lambda i: (i, 0)),
        ),
        compiler_params=pltpu.CompilerParams(
            dimension_semantics=("parallel",),
            vmem_limit_bytes=48 * 1024 * 1024,
        ),
    )(x2, gamma2, beta2)

    if padded_rows != rows:
        out = out[:rows]
    return out.reshape(B, L, D)


def layer_norm_ref(x, gamma, beta, epsilon=1e-6):
    mean = jnp.mean(x, axis=-1, keepdims=True)
    var = jnp.sum((x - mean) ** 2, axis=-1, keepdims=True) / (x.shape[-1] - 1)
    std = jnp.sqrt(var)
    return gamma * (x - mean) / (std + epsilon) + beta


if __name__ == "__main__":
    B, L, D = 2, 8, 32
    key = jax.random.PRNGKey(0)
    x = jax.random.normal(key, (B, L, D), dtype=jnp.float32)

    # Deterministic parameter init, matching nn.Parameter(torch.ones/zeros(features))
    gamma = jnp.ones((D,), dtype=jnp.float32)
    beta = jnp.zeros((D,), dtype=jnp.float32)

    y = layer_norm(x, gamma, beta)
    y = jax.block_until_ready(y)

    y_ref = layer_norm_ref(x, gamma, beta)
    assert jnp.allclose(y, y_ref, atol=1e-5, rtol=1e-5), "mismatch vs reference"

    print("KERNEL_OK")
</pallas_src>

<mosaic_0001>
module attributes {stable_mosaic.version = 11 : i64} {
  func.func @_layernorm_kernel(%arg0: i32, %arg1: memref<16x32xf32, #tpu.memory_space<vmem>>, %arg2: memref<1x32xf32, #tpu.memory_space<vmem>>, %arg3: memref<1x32xf32, #tpu.memory_space<vmem>>, %arg4: memref<16x32xf32, #tpu.memory_space<vmem>>) attributes {dimension_semantics = [#tpu.dimension_semantics<parallel>], iteration_bounds = array<i64: 1>, scalar_prefetch = 0 : i64, scratch_operands = 0 : i64, tpu.core_type = #tpu.core_type<tc>, window_params = [{transform_indices = @transform_0, window_bounds = array<i64: 16, 32>}, {pipeline_mode = #tpu.pipeline_mode<synchronous>, transform_indices = @transform_1, window_bounds = array<i64: 1, 32>}, {pipeline_mode = #tpu.pipeline_mode<synchronous>, transform_indices = @transform_2, window_bounds = array<i64: 1, 32>}, {transform_indices = @transform_3, window_bounds = array<i64: 16, 32>}]} {
    %c0 = arith.constant 0 : index
    %c0_0 = arith.constant 0 : index
    %0 = vector.load %arg1[%c0, %c0_0] : memref<16x32xf32, #tpu.memory_space<vmem>>, vector<16x32xf32>
    %c0_1 = arith.constant 0 : index
    %c0_2 = arith.constant 0 : index
    %1 = vector.load %arg2[%c0_1, %c0_2] : memref<1x32xf32, #tpu.memory_space<vmem>>, vector<1x32xf32>
    %c0_3 = arith.constant 0 : index
    %c0_4 = arith.constant 0 : index
    %2 = vector.load %arg3[%c0_3, %c0_4] : memref<1x32xf32, #tpu.memory_space<vmem>>, vector<1x32xf32>
    %cst = arith.constant dense<0.000000e+00> : vector<16xf32>
    %3 = vector.multi_reduction <add>, %0, %cst [1] : vector<16x32xf32> to vector<16xf32>
    %4 = vector.shape_cast %3 : vector<16xf32> to vector<16x1xf32>
    %cst_5 = arith.constant 3.200000e+01 : f32
    %5 = vector.broadcast %cst_5 : f32 to vector<16x1xf32>
    %6 = arith.divf %4, %5 : vector<16x1xf32>
    %7 = vector.broadcast %6 : vector<16x1xf32> to vector<16x32xf32>
    %8 = arith.subf %0, %7 : vector<16x32xf32>
    %9 = arith.mulf %8, %8 : vector<16x32xf32>
    %cst_6 = arith.constant dense<0.000000e+00> : vector<16xf32>
    %10 = vector.multi_reduction <add>, %9, %cst_6 [1] : vector<16x32xf32> to vector<16xf32>
    %11 = vector.shape_cast %10 : vector<16xf32> to vector<16x1xf32>
    %cst_7 = arith.constant 0.0322580636 : f32
    %12 = vector.broadcast %cst_7 : f32 to vector<16x1xf32>
    %13 = arith.mulf %11, %12 : vector<16x1xf32>
    %14 = math.sqrt %13 : vector<16x1xf32>
    %cst_8 = arith.constant 9.99999997E-7 : f32
    %15 = vector.broadcast %cst_8 : f32 to vector<16x1xf32>
    %16 = arith.addf %14, %15 : vector<16x1xf32>
    %17 = tpu.reciprocal %16 : vector<16x1xf32> -> vector<16x1xf32>
    %18 = vector.broadcast %1 : vector<1x32xf32> to vector<16x32xf32>
    %19 = vector.broadcast %17 : vector<16x1xf32> to vector<16x32xf32>
    %20 = arith.mulf %18, %19 : vector<16x32xf32>
    %21 = arith.mulf %8, %20 : vector<16x32xf32>
    %22 = vector.broadcast %2 : vector<1x32xf32> to vector<16x32xf32>
    %23 = arith.addf %21, %22 : vector<16x32xf32>
    %c0_9 = arith.constant 0 : index
    %c0_10 = arith.constant 0 : index
    %24 = vector.load %arg4[%c0_9, %c0_10] : memref<16x32xf32, #tpu.memory_space<vmem>>, vector<16x32xf32>
    tpu.vector_store %arg4[%c0_9, %c0_10], %23 {strides = array<i32>} : memref<16x32xf32, #tpu.memory_space<vmem>>, vector<16x32xf32>,
    return
  }
  func.func @transform_0(%arg0: i32) -> (i32, i32) {
    %c0_i32 = arith.constant 0 : i32
    %c0_i32_0 = arith.constant 0 : i32
    return %arg0, %c0_i32 : i32, i32
  }
  func.func @transform_1(%arg0: i32) -> (i32, i32) {
    %c0_i32 = arith.constant 0 : i32
    %c0_i32_0 = arith.constant 0 : i32
    %c0_i32_1 = arith.constant 0 : i32
    return %c0_i32, %c0_i32_0 : i32, i32
  }
  func.func @transform_2(%arg0: i32) -> (i32, i32) {
    %c0_i32 = arith.constant 0 : i32
    %c0_i32_0 = arith.constant 0 : i32
    %c0_i32_1 = arith.constant 0 : i32
    return %c0_i32, %c0_i32_0 : i32, i32
  }
  func.func @transform_3(%arg0: i32) -> (i32, i32) {
    %c0_i32 = arith.constant 0 : i32
    %c0_i32_0 = arith.constant 0 : i32
    return %arg0, %c0_i32 : i32, i32
  }
}

</mosaic_0001>

<bundles_post_ra>
// kernel: tpu_custom_call.1
= control target key start
LH: loop header
LB: loop body
LE: loop exit
PB: predicated region body
PF: predicated region fallthrough
CT: control target
= control target key end

     0   :  { %8 = vsyncpa [#allocation3], 0  ;;  %s216_s0 = inlined_call_operand.hbm [shape: f32[16,32], index: 0, kind: input, shape index: {}]   ;;  %s217_s1 = inlined_call_operand.vmem [shape: f32[1,32], index: 1, kind: input, shape index: {}]   ;;  %s218_s2 = inlined_call_operand.vmem [shape: f32[1,32], index: 2, kind: input, shape index: {}]   ;;  %s219_s3 = inlined_call_operand.hbm [shape: f32[16,32], index: 3, kind: output, shape index: {}]  }
   0x1   :  { %9 = vsyncpa [#allocation4], 0  ;;  %s168_s12 = smov [#allocation2]  }
   0x2   :  { %s15_s13 = sshll.u32 %s168_s12, 4  ;;  %s16_s13 = int_to_ptr.vmem [resolvable:$true] %s15_s13 }
   0x3   :  { %s132_s14 = scalar_lea.vmem %s16_s13, 256  ;;  %p137_p1 = scmp.lt.s32.totalorder %s16_s13, %s16_s13 }
   0x4   :  { %p133_p0 = scmp.ne.s32.totalorder %s16_s13, %s132_s14  ;;  %p138_p2 = scmp.lt.s32.totalorder %s132_s14, %s132_s14 }
   0x6   :  { %p139_p3 = por %p138_p2, %p137_p1 }
   0x8   :  { %p140_p4 = pnand %p139_p3, %p133_p0 }
   0xa   :  { %143 = shalt.err (!%p140_p4)
}
   0xb   :  { %s169_s15 = smov 128   ;;  %s170_s16 = smov 8  }
   0xc   :  { %21 = dma.hbm_to_vmem [thread:$0]  %s216_s0, 256, %s16_s13, [#allocation3], %s169_s15, %s169_s15, %s170_s16  }
   0xd   :  { %164 = dma.done.wait [#allocation3], 256  }
   0xe   :  { %165 = vsyncadd [#allocation3], 4294967040  ;;  %vm33_vm0 = vcmask 261120   ;;  %v29_v0 = vld [vmem:[#allocation2] sm:$0xff]  ;;  %v30_v1 = vld [vmem:[#allocation2 + $0x8] sm:$0xff]  ;;  %s171_s22 = smov [#allocation5]  }
   0xf   :  { %v34_v2 = vsel %vm33_vm0, %v29_v0, 0.0  ;;  %v37_v3 = vsel %vm33_vm0, %v30_v1, 0.0  ;;  %v110_v30 = vld [vmem:[%s217_s1] ss:$0 sm:$0xff]  ;;  %s98_s23 = sshll.u32 %s171_s22, 4  ;;  %s99_s23 = int_to_ptr.vmem [resolvable:$true] %s98_s23 }
  0x10   :  { %35 = vadd.xlane.f32.xlu0 %v34_v2  ;;  %v111_v33 = vld [vmem:[%s218_s2] ss:$0 sm:$0xff]  ;;  %s144_s1 = scalar_lea.vmem %s99_s23, 256  ;;  %p149_p6 = scmp.lt.s32.totalorder %s99_s23, %s99_s23 }
  0x11   :  { %p145_p5 = scmp.ne.s32.totalorder %s99_s23, %s144_s1  ;;  %p150_p7 = scmp.lt.s32.totalorder %s144_s1, %s144_s1 }
  0x13   :  { %p151_p8 = por %p150_p7, %p149_p6 }
  0x14   :  { %38 = vadd.xlane.f32.xlu0 %v37_v3 }
  0x15   :  { %p152_p9 = pnand %p151_p8, %p145_p5 }
  0x99   :  { %v36_v4 = vpop.xlane.xlu0 %35 }
  0x9a   :  { %v41_v5 = vmul.f32 0.03125, %v36_v4 }
  0x9c   :  { %v43_v6 = vsub.f32 %v29_v0, %v41_v5 }
  0x9d   :  { %v39_v7 = vpop.xlane.xlu0 %38 }
  0x9e   :  { %v42_v8 = vmul.f32 0.03125, %v39_v7  ;;  %v45_v9 = vmul.f32 %v43_v6, %v43_v6 }
  0xa0   :  { %v44_v10 = vsub.f32 %v30_v1, %v42_v8  ;;  %v47_v11 = vsel %vm33_vm0, %v45_v9, 0.0 }
  0xa1   :  { %48 = vadd.xlane.f32.xlu1 %v47_v11 }
  0xa2   :  { %v46_v12 = vmul.f32 %v44_v10, %v44_v10 }
  0xa4   :  { %v50_v13 = vsel %vm33_vm0, %v46_v12, 0.0 }
  0xa5   :  { %51 = vadd.xlane.f32.xlu1 %v50_v13 }
 0x12a   :  { %v49_v14 = vpop.xlane.xlu1 %48 }
 0x12b   :  { %v53_v15 = vmul.f32 0.032258064, %v49_v14 }
 0x12d   :  { %116 = vrsqrt.f32 %v53_v15  ;;  %vm57_vm1 = vcmp.eq.f32.partialorder %v53_v15, inf  ;;  %v60_v20 = vand.u32 2147483648, %v53_v15  ;;  %vm59_vm2 = vcmp.eq.f32.partialorder %v53_v15, 0.0 }
 0x12e   :  { %v52_v16 = vpop.xlane.xlu1 %51 }
 0x12f   :  { %v54_v17 = vmul.f32 0.032258064, %v52_v16 }
 0x131   :  { %118 = vrsqrt.f32 %v54_v17  ;;  %vm64_vm3 = vcmp.eq.f32.partialorder %v54_v17, inf  ;;  %v67_v26 = vand.u32 2147483648, %v54_v17  ;;  %vm66_vm4 = vcmp.eq.f32.partialorder %v54_v17, 0.0 }
 0x13a   :  { %v117_v18 = vpop.eup %116 }
 0x13b   :  { %v56_v19 = vmul.f32 %v117_v18, %v53_v15 }
 0x13d   :  { %v58_v21 = vsel %vm57_vm1, %v53_v15, %v56_v19 }
 0x13e   :  { %v119_v22 = vpop.eup %118  ;;  %v61_v23 = vsel %vm59_vm2, %v60_v20, %v58_v21 }
 0x13f   :  { %v69_v24 = vadd.f32 1e-06, %v61_v23  ;;  %v63_v25 = vmul.f32 %v119_v22, %v54_v17 }
 0x141   :  { %120 = vrcp.f32 %v69_v24  ;;  %v65_v27 = vsel %vm64_vm3, %v54_v17, %v63_v25 }
 0x142   :  { %v68_v28 = vsel %vm66_vm4, %v67_v26, %v65_v27 }
 0x143   :  { %v70_v29 = vadd.f32 1e-06, %v68_v28 }
 0x145   :  { %122 = vrcp.f32 %v70_v29 }
 0x14e   :  { %v121_v31 = vpop.eup %120 }
 0x14f   :  { %v79_v32 = vmul.f32 %v121_v31, %v110_v30 }
 0x151   :  { %v81_v34 = vmul.f32 %v79_v32, %v43_v6 }
 0x152   :  { %v123_v35 = vpop.eup %122 }
 0x153   :  { %v80_v36 = vmul.f32 %v123_v35, %v110_v30  ;;  %v89_v37 = vadd.f32 %v111_v33, %v81_v34 }
 0x155   :  { %v82_v38 = vmul.f32 %v80_v36, %v44_v10  ;;  %91 = vst.msk [vmem:[#allocation5] sm:$0xff] %vm33_vm0, %v89_v37 }
 0x157   :  { %v90_v39 = vadd.f32 %v111_v33, %v82_v38 }
 0x159   :  { %92 = vst.msk [vmem:[#allocation5 + $0x8] sm:$0xff] %vm33_vm0, %v90_v39 }
 0x15a   :  { %155 = shalt.err (!%p152_p9)
}
 0x15b   :  { %104 = dma.vmem_to_hbm [thread:$0]  %s99_s23, 256, %s219_s3, [#allocation4], %s169_s15, %s169_s15, %s170_s16  }
 0x15c   :  { %166 = dma.done.wait [#allocation4], 256  }
 0x15d   :  { %167 = vsyncadd [#allocation4], 4294967040 }
 0x15e   :  { %108 = vsyncpa [#allocation3], 1 }
 0x15f   :  { %109 = vsyncpa [#allocation4], 1 }

</bundles_post_ra>
